<compile_context>
chip_gen: v5e
topology: v5e:2x2
jax: 0.10.0
libtpu: 0.0.40
codegen_flags: <defaults>
</compile_context>

<pallas_src>
import jax
import jax.numpy as jnp
from jax.experimental import pallas as pl
from jax.experimental.pallas import tpu as pltpu

# Problem sizes consistent with the module (toy test shapes).
N, C, H, W = 2, 4, 16, 16
CH = C // 2            # hidden width of the attention MLP
SLOPE = 0.01           # LeakyReLUWithLearnable initial slope


def attention_kernel(x_ref, w_ref, slope_ref, out_ref):
    """x_ref: (N*C, H*W) VMEM; w_ref: (2, N*C, N*C) VMEM; slope_ref: (1,) SMEM."""
    x = x_ref[...]                                   # (NC, HW), lane-dense slab
    slope = slope_ref[0]                             # learnable LeakyReLU slope

    # Global average pool over the spatial (lane) axis -> column vector.
    pooled = jnp.mean(x, axis=-1, keepdims=True)     # (NC, 1)

    # fc1 as a block-diagonal matvec on the pooled column (per-batch CxC block).
    h = jnp.dot(w_ref[0], pooled, preferred_element_type=jnp.float32)    # (NC, 1)
    h = jnp.where(h >= 0, h, slope * h)              # learnable LeakyReLU

    # fc2 (block-diagonal) + sigmoid -> per-(n, c) attention weights.
    att = jnp.dot(w_ref[1], h, preferred_element_type=jnp.float32)       # (NC, 1)
    att = jax.nn.sigmoid(att)

    # Channel attention: broadcast the (NC, 1) column along the 256 lanes.
    out_ref[...] = x * att


def _pack_weights(fa1, fa2, n):
    """Pack fc1/fc2 into one (2, n*C, n*C) stack of block-diagonal matrices.

    A1[b*C + o, b*C + j] = fa1[o, j] (o < C//2), A2[b*C + c, b*C + i] = fa2[c, i]
    (i < C//2); all other entries are zero, so the matvec never mixes batches and
    the zero hidden rows stay zero through the LeakyReLU.
    """
    ch, c = fa1.shape
    blk1 = jnp.zeros((c, c), jnp.float32).at[:ch, :].set(fa1.astype(jnp.float32))
    blk2 = jnp.zeros((c, c), jnp.float32).at[:, :ch].set(fa2.astype(jnp.float32))
    eye = jnp.eye(n, dtype=jnp.float32)
    return jnp.stack([jnp.kron(eye, blk1), jnp.kron(eye, blk2)])   # (2, n*c, n*c)


@jax.jit
def attention_module(x, fa1, fa2, slope=SLOPE):
    n, c, h, w = x.shape
    ch = fa1.shape[0]
    assert fa1.shape == (ch, c) and fa2.shape == (c, ch) and x.shape[1] == c, \
        "fc1/fc2 weight shapes inconsistent with input channel count"
    hw = h * w
    nc = n * c

    x2 = x.reshape(nc, hw).astype(jnp.float32)       # lane-dense (8, 256) slab
    w_packed = _pack_weights(fa1, fa2, n)            # single (2, NC, NC) operand
    slope_arr = jnp.asarray([slope], jnp.float32)

    out = pl.pallas_call(
        attention_kernel,
        out_shape=jax.ShapeDtypeStruct((nc, hw), jnp.float32),
        in_specs=[
            pl.BlockSpec(memory_space=pltpu.VMEM),   # activation slab (whole array)
            pl.BlockSpec(memory_space=pltpu.VMEM),   # packed block-diag fc1/fc2
            pl.BlockSpec(memory_space=pltpu.SMEM),   # learnable slope scalar
        ],
        out_specs=pl.BlockSpec(memory_space=pltpu.VMEM),
        input_output_aliases={0: 0},                 # donate x2's HBM buffer
    )(x2, w_packed, slope_arr)
    return out.reshape(n, c, h, w)


def reference(x, fa1, fa2, slope=SLOPE):
    y = x.mean(axis=(2, 3))                           # global_pool  (N, C)
    y = jnp.einsum("oc,nc->no", fa1, y)               # fc1          (N, C//2)
    y = jnp.where(y >= 0, y, slope * y)               # leaky relu
    y = jnp.einsum("oc,nc->no", fa2, y)               # fc2          (N, C)
    y = jax.nn.sigmoid(y)
    return x * y[:, :, None, None]


if __name__ == "__main__":
    key = jax.random.PRNGKey(0)
    ks = jax.random.split(key, 3)
    # Deterministic synthetic parameters (shapes from __init__).
    fa1 = jax.random.normal(ks[0], (CH, C), jnp.float32) * 0.3   # fc1 (1x1 conv)
    fa2 = jax.random.normal(ks[1], (C, CH), jnp.float32) * 0.3   # fc2 (1x1 conv)
    x = jax.random.normal(ks[2], (N, C, H, W), jnp.float32)

    ref = reference(x, fa1, fa2, SLOPE)

    out = attention_module(x, fa1, fa2, SLOPE)
    out = jax.block_until_ready(out)

    max_err = float(jnp.max(jnp.abs(out - ref)))
    assert max_err < 1e-4, f"mismatch vs reference: {max_err}"

    print("KERNEL_OK")
</pallas_src>

<mosaic_0001>
module attributes {stable_mosaic.version = 11 : i64} {
  func.func @attention_kernel(%arg0: memref<8x256xf32, #tpu.memory_space<vmem>>, %arg1: memref<2x8x8xf32, #tpu.memory_space<vmem>>, %arg2: memref<1xf32, #tpu.memory_space<smem>>, %arg3: memref<8x256xf32, #tpu.memory_space<vmem>>) attributes {dimension_semantics = [], scalar_prefetch = 0 : i64, scratch_operands = 0 : i64, tpu.core_type = #tpu.core_type<tc>} {
    %c0 = arith.constant 0 : index
    %c0_0 = arith.constant 0 : index
    %0 = vector.load %arg0[%c0, %c0_0] : memref<8x256xf32, #tpu.memory_space<vmem>>, vector<8x256xf32>
    %c0_1 = arith.constant 0 : index
    %1 = memref.load %arg2[%c0_1] : memref<1xf32, #tpu.memory_space<smem>>
    %cst = arith.constant dense<0.000000e+00> : vector<8xf32>
    %2 = vector.multi_reduction <add>, %0, %cst [1] : vector<8x256xf32> to vector<8xf32>
    %3 = vector.shape_cast %2 : vector<8xf32> to vector<8x1xf32>
    %cst_2 = arith.constant 2.560000e+02 : f32
    %4 = vector.broadcast %cst_2 : f32 to vector<8x1xf32>
    %5 = arith.divf %3, %4 : vector<8x1xf32>
    %c0_3 = arith.constant 0 : index
    %c0_4 = arith.constant 0 : index
    %c0_5 = arith.constant 0 : index
    %6 = vector.load %arg1[%c0_3, %c0_4, %c0_5] : memref<2x8x8xf32, #tpu.memory_space<vmem>>, vector<1x8x8xf32>
    %7 = vector.shape_cast %6 : vector<1x8x8xf32> to vector<8x8xf32>
    %cst_6 = arith.constant dense<0.000000e+00> : vector<8x1xf32>
    %8 = tpu.matmul %7, %5, %cst_6 {dimension_numbers = #tpu.dot_dimension_numbers<[1], [0], [0], [1], [0, 0, 1, 1], [], []>} : vector<8x8xf32>, vector<8x1xf32>, vector<8x1xf32> -> vector<8x1xf32>
    %cst_7 = arith.constant 0.000000e+00 : f32
    %9 = vector.broadcast %cst_7 : f32 to vector<8x1xf32>
    %10 = arith.cmpf oge, %8, %9 : vector<8x1xf32>
    %11 = vector.broadcast %1 : f32 to vector<8x1xf32>
    %12 = arith.mulf %11, %8 : vector<8x1xf32>
    %13 = arith.select %10, %8, %12 : vector<8x1xi1>, vector<8x1xf32>
    %c1 = arith.constant 1 : index
    %c0_8 = arith.constant 0 : index
    %c0_9 = arith.constant 0 : index
    %14 = vector.load %arg1[%c1, %c0_8, %c0_9] : memref<2x8x8xf32, #tpu.memory_space<vmem>>, vector<1x8x8xf32>
    %15 = vector.shape_cast %14 : vector<1x8x8xf32> to vector<8x8xf32>
    %cst_10 = arith.constant dense<0.000000e+00> : vector<8x1xf32>
    %16 = tpu.matmul %15, %13, %cst_10 {dimension_numbers = #tpu.dot_dimension_numbers<[1], [0], [0], [1], [0, 0, 1, 1], [], []>} : vector<8x8xf32>, vector<8x1xf32>, vector<8x1xf32> -> vector<8x1xf32>
    %17 = arith.negf %16 : vector<8x1xf32>
    %18 = math.exp %17 : vector<8x1xf32>
    %cst_11 = arith.constant 1.000000e+00 : f32
    %19 = vector.broadcast %cst_11 : f32 to vector<8x1xf32>
    %20 = arith.addf %19, %18 : vector<8x1xf32>
    %21 = arith.divf %19, %20 : vector<8x1xf32>
    %22 = vector.broadcast %21 : vector<8x1xf32> to vector<8x256xf32>
    %23 = arith.mulf %0, %22 : vector<8x256xf32>
    %c0_12 = arith.constant 0 : index
    %c0_13 = arith.constant 0 : index
    %24 = vector.load %arg3[%c0_12, %c0_13] : memref<8x256xf32, #tpu.memory_space<vmem>>, vector<8x256xf32>
    tpu.vector_store %arg3[%c0_12, %c0_13], %23 {strides = array<i32>} : memref<8x256xf32, #tpu.memory_space<vmem>>, vector<8x256xf32>,
    return
  }
}

</mosaic_0001>

<bundles_post_ra>
// kernel: attention_module.1
= control target key start
LH: loop header
LB: loop body
LE: loop exit
PB: predicated region body
PF: predicated region fallthrough
CT: control target
= control target key end

     0   :  { %v128_v3 = vmov 256.0   ;;  %vm30_vm1 = vcmask 64512   ;;  %v129_v18 = vmov 0   ;;  %s171_s0 = inlined_call_operand.vmem [shape: f32[8,256], index: 0, kind: input, shape index: {}, may-alias: {0,3}]   ;;  %s172_s1 = inlined_call_operand.vmem [shape: f32[2,8,8], index: 1, kind: input, shape index: {}]   ;;  %s173_s2 = inlined_call_operand.<no memory space> [shape: f32[1], index: 2, kind: input, shape index: {}]   ;;  %s174_s3 = inlined_call_operand.vmem [shape: f32[8,256], index: 3, kind: output, shape index: {}, may-alias: {0,3}]  }
   0x1   :  { %v15_v0 = vld [vmem:[%s171_s0] sm:$0xff]  ;;  %v16_v1 = vld [vmem:[%s171_s0 + $0x8] sm:$0xff]  ;;  %122 = vrcp.f32 %v128_v3  ;;  %v55_v13 = vstv %s173_s2  ;;  %121 = vset.pattern.permute.xlu0 %v129_v18 }
   0x2   :  { %v18_v2 = vadd.f32 %v16_v1, %v15_v0  ;;  %v29_v12 = vld [vmem:[%s172_s1] sm:$0xff]  ;;  %v116_v16 = vld [vmem:[%s172_s1 + $0x8] sm:$0xff] }
   0x4   :  { %19 = vadd.xlane.f32.xlu0 %v18_v2 }
   0x7   :  { %v123_v4 = vpop.eup %122 }
   0x8   :  { %v22_v5 = vmul.f32 256.0, %v123_v4  ;;  %vm26_vm0 = vweird.f32 %v123_v4 }
   0xa   :  { %v23_v6 = vsub.f32 1.0, %v22_v5 }
   0xc   :  { %v24_v7 = vmul.f32 %v123_v4, %v23_v6 }
   0xe   :  { %v25_v8 = vadd.f32 %v123_v4, %v24_v7 }
  0x10   :  { %v27_v9 = vsel %vm26_vm0, %v123_v4, %v25_v8 }
  0x77   :  { %v20_v10 = vpop.xlane.xlu0 %19 }
  0x78   :  { %v28_v11 = vmul.f32 %v27_v9, %v20_v10 }
  0x7a   :  { %49 = vmatpush.msra.mxu0 %v28_v11 }
  0x7b   :  { %115 = vmatmul.msk.f32.vlgmr.msra.gmra.mxu0 %vm30_vm1, %v29_v12 }
  0xf8   :  { %v51_v14 = vpop.f32.mrf.mxu0 }
  0xf9   :  { %vm54_vm2 = vcmp.ge.f32.partialorder %v51_v14, 0.0  ;;  %v56_v15 = vmul.f32 %v55_v13, %v51_v14 }
  0xfb   :  { %v57_v17 = vsel %vm54_vm2, %v51_v14, %v56_v15 }
  0xfc   :  { %78 = vmatpush.msra.mxu1 %v57_v17 }
  0xfd   :  { %117 = vmatmul.msk.f32.vlgmr.msra.gmra.mxu1 %vm30_vm1, %v116_v16 }
 0x17a   :  { %v80_v19 = vpop.f32.mrf.mxu1 }
 0x17b   :  { %v118_v20 = vmul.f32 -1.442695, %v80_v19 }
 0x17d   :  { %124 = vpow2.f32 %v118_v20 }
 0x183   :  { %v125_v21 = vpop.eup %124 }
 0x184   :  { %v86_v22 = vadd.f32 1.0, %v125_v21 }
 0x186   :  { %126 = vrcp.f32 %v86_v22  ;;  %v98_v26 = vand.u32 2147483648, %v86_v22  ;;  %v96_v28 = vand.u32 2147483647, %v86_v22  ;;  %vm92_vm4 = vweird.f32 %v86_v22 }
 0x188   :  { %v99_v30 = vor.u32 1.1754944e-38, %v98_v26  ;;  %vm97_vm6 = vcmp.eq.f32.partialorder %v96_v28, 8.507059e+37 }
 0x18c   :  { %v127_v23 = vpop.eup %126 }
 0x18d   :  { %v88_v24 = vmul.f32 %v127_v23, %v86_v22  ;;  %vm93_vm3 = vweird.f32 %v127_v23 }
 0x18e   :  { %vm94_vm5 = vmor %vm92_vm4, %vm93_vm3 }
 0x18f   :  { %v89_v25 = vsub.f32 1.0, %v88_v24 }
 0x191   :  { %v90_v27 = vmul.f32 %v127_v23, %v89_v25 }
 0x193   :  { %v91_v29 = vadd.f32 %v127_v23, %v90_v27 }
 0x195   :  { %v95_v31 = vsel %vm94_vm5, %v127_v23, %v91_v29 }
 0x196   :  { %v100_v32 = vsel %vm97_vm6, %v99_v30, %v95_v31 }
 0x197   :  { %104 = vperm.xlu0 %121, %v100_v32  }
 0x209   :  { %v105_v33 = vpop.permute.xlu0 %104 }
 0x20a   :  { %v107_v34 = vmul.f32 %v105_v33, %v15_v0  ;;  %v108_v35 = vmul.f32 %v105_v33, %v16_v1 }
 0x20c   :  { %109 = vst [vmem:[%s174_s3] sm:$0xff] %v107_v34 }
 0x20d   :  { %110 = vst [vmem:[%s174_s3 + $0x8] sm:$0xff] %v108_v35 }

</bundles_post_ra>
